<compile_context>
chip_gen: v7x
topology: tpu7x:2x2x1
jax: 0.10.0
libtpu: 0.0.40
codegen_flags: <defaults>
</compile_context>

<pallas_src>
import jax
import jax.numpy as jnp
from jax import lax
from jax.experimental import pallas as pl
from jax.experimental.pallas import tpu as pltpu


def _round_up(x, m):
    return ((x + m - 1) // m) * m


def _cdiv(a, b):
    return -(-a // b)


def _choose_tiles(n, n_anchors, col_tile):
    """Returns (tm, tn, n_pad).  Lane dims are multiples of 128; tm a multiple of 16."""
    n128 = _round_up(n, 128)
    if n128 <= col_tile:
        tn = n128
        n_pad = n128
    else:
        tn = col_tile
        n_pad = _round_up(n, tn)
    # >=2 row tiles whenever possible so the "parallel" axis can shard across both
    # TensorCores on v7x; tm stays a multiple of 16 (bf16 sublane packing) and <=256.
    tm = max(16, min(256, _round_up(_cdiv(n_anchors, 2), 16)))
    return tm, tn, n_pad


def _make_supcon_kernel(*, base_scale, n_valid, tm, tn, has_pad, use_mask_input):
    """base_scale = -(temperature / base_temperature); 1/T is already folded into q."""
    n_chunks = tn // 128

    def kernel(*refs):
        if use_mask_input:
            (q_ref, k_ref, pmask_ref, out_ref,
             m_sc, l_sc, ps_sc, cnt_sc) = refs
        else:
            (q_ref, k_ref, cls_row_ref, cls_col_ref, out_ref,
             m_sc, l_sc, ps_sc, cnt_sc) = refs

        i = pl.program_id(0)          # anchor-row tile   ("parallel")
        kk = pl.program_id(1)         # contrast-col tile ("arbitrary", reduction)
        last_col = pl.num_programs(1) - 1

        @pl.when(kk == 0)
        def _init():
            m_sc[...] = jnp.full(m_sc.shape, -jnp.inf, jnp.float32)
            l_sc[...] = jnp.zeros(l_sc.shape, jnp.float32)
            ps_sc[...] = jnp.zeros(ps_sc.shape, jnp.float32)
            cnt_sc[...] = jnp.zeros(cnt_sc.shape, jnp.float32)

        # One MXU pass for the whole [tm, tn] tile (bf16 in, f32 accumulate).
        # 1/temperature is folded into q in the wrapper, so s is already in logit units.
        s = lax.dot_general(q_ref[...], k_ref[...], (((1,), (1,)), ((), ())),
                            preferred_element_type=jnp.float32)

        if not use_mask_input:
            cls_row = cls_row_ref[...]            # [tm, 1]  int32
            cls_col = cls_col_ref[...]            # [1, tn]  int32

        def tile_update(masked):
            # Per-tile partials carried as SSA [tm,1] values; scratch refs are
            # read once / written once per grid step.
            m_run = m_sc[...]
            l_run = l_sc[...]
            ps_run = ps_sc[...]
            cnt_run = cnt_sc[...]
            # Strip-mine the softmax / mask phase over 128-lane chunks so the
            # chunk temporaries stay in vregs (only `s` itself round-trips VMEM).
            for g in range(n_chunks):
                lo, hi = g * 128, (g + 1) * 128
                sg = s[:, lo:hi]                                     # [tm, 128]
                if masked:
                    col_ids = (kk * tn + lo
                               + lax.broadcasted_iota(jnp.int32, (tm, 128), 1))
                    row_ids = i * tm + lax.broadcasted_iota(jnp.int32, (tm, 128), 0)
                    not_self = row_ids != col_ids
                    if has_pad:
                        col_valid = col_ids < n_valid
                        keep = jnp.logical_and(not_self, col_valid)
                        smax_src = jnp.where(col_valid, sg, -jnp.inf)
                    else:
                        keep = not_self
                        smax_src = sg
                else:
                    smax_src = sg

                # Online log-sum-exp: self stays in the running max but is
                # excluded from the exp-sum, exactly like the PyTorch reference.
                m_new = jnp.maximum(m_run, jnp.max(smax_src, axis=1, keepdims=True))
                alpha = jnp.exp(m_run - m_new)
                pg = jnp.exp(sg - m_new)
                if masked:
                    pg = jnp.where(keep, pg, 0.0)
                l_run = alpha * l_run + jnp.sum(pg, axis=1, keepdims=True)
                m_run = m_new

                # Positive weights (mask values are used as weights, matching the
                # reference's (mask * log_prob) for non-binary masks).
                if use_mask_input:
                    wg = pmask_ref[:, lo:hi].astype(jnp.float32)
                else:
                    wg = (cls_row == cls_col[:, lo:hi]).astype(jnp.float32)
                if masked:
                    wg = jnp.where(keep, wg, 0.0)
                ps_run = ps_run + jnp.sum(wg * sg, axis=1, keepdims=True)
                cnt_run = cnt_run + jnp.sum(wg, axis=1, keepdims=True)

            m_sc[...] = m_run
            l_sc[...] = l_run
            ps_sc[...] = ps_run
            cnt_sc[...] = cnt_run

        # Most (i,kk) tiles neither touch the self-contrast diagonal nor contain
        # padded columns; those take a mask-free fast path.
        row_lo = i * tm
        col_lo = kk * tn
        on_diag = jnp.logical_and(row_lo < col_lo + tn, col_lo < row_lo + tm)
        if has_pad:
            needs_mask = jnp.logical_or(on_diag, kk == last_col)
        else:
            needs_mask = on_diag

        @pl.when(needs_mask)
        def _masked_tile():
            tile_update(True)

        @pl.when(jnp.logical_not(needs_mask))
        def _fast_tile():
            tile_update(False)

        @pl.when(kk == last_col)
        def _finalize():
            log_denom = m_sc[...] + jnp.log(l_sc[...])
            # sum_j w*log_prob = sum_j w*s - cnt*(row_max + log denom).
            # NOTE: anchors with zero positives give 0/0 = NaN, matching PyTorch.
            # Exact division (finalize runs once per row tile; approx EUP recip
            # saved nothing and cost ~1e-3 relative error).
            mlpp = (ps_sc[...] - cnt_sc[...] * log_denom) / cnt_sc[...]
            # Lane-dense, unmasked store: broadcast the per-row loss across the
            # 128-lane output block; the wrapper reads column 0.
            out_ref[...] = jnp.broadcast_to(base_scale * mlpp, (tm, 128))

    return kernel


def lacvit_loss(features, labels=None, mask=None, *, temperature=0.07,
                contrast_mode="all", base_temperature=0.07, col_tile=512):
    """JAX/Pallas equivalent of LaCViTLoss.forward.

    col_tile: column (contrast) DMA tile width; 512 fits v5e's 16 MiB default
    scoped VMEM even for d_pad=2048, can be raised to 1024 on v6e.
    """
    assert col_tile % 128 == 0 and col_tile >= 128
    if features.ndim < 3:
        raise ValueError("`features` needs to be [bsz, n_views, ...]")
    if features.ndim > 3:
        features = features.reshape(features.shape[0], features.shape[1], -1)
    bsz, n_views, d = features.shape

    if labels is not None and mask is not None:
        raise ValueError("Cannot define both `labels` and `mask`")
    if contrast_mode == "all":
        anchor_count = n_views
    elif contrast_mode == "one":
        anchor_count = 1
    else:
        raise ValueError(f"Unknown mode: {contrast_mode}")

    n = n_views * bsz                 # number of contrast rows
    n_anchors = anchor_count * bsz    # anchors are the first n_anchors rows of cf

    # contrast_feature = cat(unbind(features, 1), 0): [N, d], view-major row order.
    cf = jnp.transpose(features, (1, 0, 2)).reshape(n, d).astype(jnp.float32)

    tm, tn, n_pad = _choose_tiles(n, n_anchors, col_tile)
    grid_rows = _cdiv(n_anchors, tm)
    grid_cols = n_pad // tn
    rows_pad = grid_rows * tm
    d_pad = _round_up(d, 128)

    inv_t = 1.0 / float(temperature)
    # Fold 1/temperature into the anchor features once (O(N*d)) instead of an
    # O(N^2) per-tile multiply inside the kernel.
    q = jnp.pad(cf[:n_anchors] * inv_t,
                ((0, rows_pad - n_anchors), (0, d_pad - d))).astype(jnp.bfloat16)
    k = jnp.pad(cf, ((0, n_pad - n), (0, d_pad - d))).astype(jnp.bfloat16)

    use_mask_input = mask is not None
    if use_mask_input:
        # Explicit (possibly asymmetric / weighted) user mask: tile only the anchor
        # rows and ship it as bf16 -> half the N^2 HBM stream of the old f32 path.
        base_mask = jnp.asarray(mask, jnp.float32)
        pos = jnp.tile(base_mask, (anchor_count, n_views))
        pos = jnp.pad(pos, ((0, rows_pad - n_anchors), (0, n_pad - n)))
        extra_inputs = (pos.astype(jnp.bfloat16),)
        extra_specs = [pl.BlockSpec((tm, tn), lambda i, kc: (i, kc))]
    else:
        if labels is None:
            cls = jnp.arange(bsz, dtype=jnp.int32)          # mask = eye(bsz)
        else:
            cls = jnp.asarray(labels).reshape(-1).astype(jnp.int32)
            if cls.shape[0] != bsz:
                raise ValueError("Num of labels does not match num of features")
        cls = jnp.tile(cls, n_views)                        # class id per contrast row
        cls_row = jnp.pad(cls[:n_anchors], (0, rows_pad - n_anchors),
                          constant_values=-1)
        cls_col = jnp.pad(cls, (0, n_pad - n), constant_values=-2)
        extra_inputs = (cls_row[:, None], cls_col[None, :])
        extra_specs = [pl.BlockSpec((tm, 1), lambda i, kc: (i, 0)),
                       pl.BlockSpec((1, tn), lambda i, kc: (0, kc))]

    kernel = _make_supcon_kernel(
        base_scale=-(float(temperature) / float(base_temperature)),
        n_valid=n, tm=tm, tn=tn, has_pad=(n_pad != n),
        use_mask_input=use_mask_input)

    out = pl.pallas_call(
        kernel,
        out_shape=jax.ShapeDtypeStruct((rows_pad, 128), jnp.float32),
        grid_spec=pltpu.PrefetchScalarGridSpec(
            num_scalar_prefetch=0,
            grid=(grid_rows, grid_cols),
            in_specs=[pl.BlockSpec((tm, d_pad), lambda i, kc: (i, 0)),   # anchors
                      pl.BlockSpec((tn, d_pad), lambda i, kc: (kc, 0)),  # contrasts
                      *extra_specs],
            out_specs=pl.BlockSpec((tm, 128), lambda i, kc: (i, 0)),
            scratch_shapes=[pltpu.VMEM((tm, 1), jnp.float32)] * 4),
        compiler_params=pltpu.CompilerParams(
            dimension_semantics=("parallel", "arbitrary"),
            # Generous but well under v7x's 64 MiB physical VMEM; double-buffered
            # q/k/mask blocks + scratch + spill scratch for the [tm,tn] f32 tile
            # stay below ~8 MiB for d_pad <= 2048 with the default tiles.
            vmem_limit_bytes=32 * 1024 * 1024),
    )(q, k, *extra_inputs)

    # Final mean over the per-anchor losses is a trivial plain-JAX reduction.
    return jnp.mean(out[:n_anchors, 0])


def _reference_loss(features, labels=None, mask=None, *, temperature=0.07,
                    contrast_mode="all", base_temperature=0.07,
                    matmul_dtype=jnp.bfloat16):
    """Pure-JAX mirror of the PyTorch forward (features rounded to bf16 so the
    comparison isolates kernel-logic errors from MXU input rounding)."""
    bsz, n_views, d = features.shape
    if labels is None and mask is None:
        base_mask = jnp.eye(bsz, dtype=jnp.float32)
    elif labels is not None:
        lab = labels.reshape(-1, 1)
        base_mask = (lab == lab.T).astype(jnp.float32)
    else:
        base_mask = jnp.asarray(mask, jnp.float32)
    cf = jnp.transpose(features, (1, 0, 2)).reshape(n_views * bsz, d)
    cf = cf.astype(matmul_dtype).astype(jnp.float32)
    if contrast_mode == "all":
        anchor, anchor_count = cf, n_views
    else:
        anchor, anchor_count = cf[:bsz], 1
    adc = (anchor @ cf.T) / temperature
    logits = adc - jnp.max(adc, axis=1, keepdims=True)
    n = n_views * bsz
    la = anchor_count * bsz
    pos = jnp.tile(base_mask, (anchor_count, n_views))
    logits_mask = jnp.ones((la, n), jnp.float32).at[
        jnp.arange(la), jnp.arange(la)].set(0.0)
    pos = pos * logits_mask
    exp_logits = jnp.exp(logits) * logits_mask
    log_prob = logits - jnp.log(exp_logits.sum(1, keepdims=True))
    mlpp = (pos * log_prob).sum(1) / pos.sum(1)
    loss = -(temperature / base_temperature) * mlpp
    return loss.mean()


if __name__ == "__main__":
    root = jax.random.PRNGKey(0)

    def check(bsz, n_views, d, n_classes, case_kwargs, col_tile=512):
        kf, kl = jax.random.split(jax.random.fold_in(root, bsz * 131 + d))
        feats = jax.random.normal(kf, (bsz, n_views, d), dtype=jnp.float32)
        feats = feats / jnp.linalg.norm(feats, axis=-1, keepdims=True)
        labels = jax.random.randint(kl, (bsz,), 0, n_classes)
        label_mask = (labels[:, None] == labels[None, :]).astype(jnp.float32)
        for kwargs in case_kwargs:
            kw = dict(kwargs)
            if kw.pop("use_labels", False):
                kw["labels"] = labels
            if kw.pop("use_mask", False):
                kw["mask"] = label_mask
            got = lacvit_loss(feats, col_tile=col_tile, **kw)
            want = _reference_loss(feats, **kw)
            jax.block_until_ready((got, want))
            assert bool(jnp.isfinite(got)), (bsz, kw, got)
            # bf16 MXU inputs -> loose tolerance vs the f32-logic reference.
            assert jnp.allclose(got, want, rtol=3e-2, atol=3e-2), (bsz, kw, got, want)

    # Tiny single-tile case: eye / labels / 'one' mode / explicit mask paths.
    check(bsz=8, n_views=2, d=32, n_classes=4, case_kwargs=[
        dict(), dict(use_labels=True),
        dict(use_labels=True, contrast_mode="one"), dict(use_mask=True)])
    # Multi column-tile case (col_tile=128 -> 3 column tiles): exercises the
    # off-diagonal fast path, column padding and d_pad > 128.
    check(bsz=160, n_views=2, d=200, n_classes=10, col_tile=128, case_kwargs=[
        dict(use_labels=True), dict(use_mask=True)])
    # Multi-chunk strip-mining case (tn=384 -> 3 lane chunks per tile).
    check(bsz=130, n_views=2, d=64, n_classes=6, case_kwargs=[
        dict(use_labels=True)])

    print("KERNEL_OK")
</pallas_src>

<mosaic_0001>
module attributes {stable_mosaic.version = 11 : i64} {
  func.func @kernel(%arg0: i32, %arg1: i32, %arg2: memref<16x128xbf16, #tpu.memory_space<vmem>>, %arg3: memref<128x128xbf16, #tpu.memory_space<vmem>>, %arg4: memref<16x1xi32, #tpu.memory_space<vmem>>, %arg5: memref<1x128xi32, #tpu.memory_space<vmem>>, %arg6: memref<16x128xf32, #tpu.memory_space<vmem>>, %arg7: memref<16x1xf32, #tpu.memory_space<vmem>>, %arg8: memref<16x1xf32, #tpu.memory_space<vmem>>, %arg9: memref<16x1xf32, #tpu.memory_space<vmem>>, %arg10: memref<16x1xf32, #tpu.memory_space<vmem>>) attributes {dimension_semantics = [#tpu.dimension_semantics<parallel>, #tpu.dimension_semantics<arbitrary>], iteration_bounds = array<i64: 1, 1>, scalar_prefetch = 0 : i64, scratch_operands = 4 : i64, tpu.core_type = #tpu.core_type<tc>, window_params = [{transform_indices = @transform_0, window_bounds = array<i64: 16, 128>}, {transform_indices = @transform_1, window_bounds = array<i64: 128, 128>}, {transform_indices = @transform_2, window_bounds = array<i64: 16, 1>}, {transform_indices = @transform_3, window_bounds = array<i64: 1, 128>}, {transform_indices = @transform_4, window_bounds = array<i64: 16, 128>}]} {
    %c0_i32 = arith.constant 0 : i32
    %0 = arith.cmpi eq, %arg1, %c0_i32 : i32
    %1 = arith.extui %0 : i1 to i32
    %c0_i32_0 = arith.constant 0 : i32
    %2 = arith.cmpi ne, %1, %c0_i32_0 : i32
    scf.if %2 {
      %cst_15 = arith.constant 0xFF800000 : f32
      %25 = vector.broadcast %cst_15 : f32 to vector<16x1xf32>
      %c0_16 = arith.constant 0 : index
      %c0_17 = arith.constant 0 : index
      %26 = vector.load %arg7[%c0_16, %c0_17] : memref<16x1xf32, #tpu.memory_space<vmem>>, vector<16x1xf32>
      tpu.vector_store %arg7[%c0_16, %c0_17], %25 {strides = array<i32>} : memref<16x1xf32, #tpu.memory_space<vmem>>, vector<16x1xf32>,
      %cst_18 = arith.constant 0.000000e+00 : f32
      %27 = vector.broadcast %cst_18 : f32 to vector<16x1xf32>
      %c0_19 = arith.constant 0 : index
      %c0_20 = arith.constant 0 : index
      %28 = vector.load %arg8[%c0_19, %c0_20] : memref<16x1xf32, #tpu.memory_space<vmem>>, vector<16x1xf32>
      tpu.vector_store %arg8[%c0_19, %c0_20], %27 {strides = array<i32>} : memref<16x1xf32, #tpu.memory_space<vmem>>, vector<16x1xf32>,
      %cst_21 = arith.constant 0.000000e+00 : f32
      %29 = vector.broadcast %cst_21 : f32 to vector<16x1xf32>
      %c0_22 = arith.constant 0 : index
      %c0_23 = arith.constant 0 : index
      %30 = vector.load %arg9[%c0_22, %c0_23] : memref<16x1xf32, #tpu.memory_space<vmem>>, vector<16x1xf32>
      tpu.vector_store %arg9[%c0_22, %c0_23], %29 {strides = array<i32>} : memref<16x1xf32, #tpu.memory_space<vmem>>, vector<16x1xf32>,
      %cst_24 = arith.constant 0.000000e+00 : f32
      %31 = vector.broadcast %cst_24 : f32 to vector<16x1xf32>
      %c0_25 = arith.constant 0 : index
      %c0_26 = arith.constant 0 : index
      %32 = vector.load %arg10[%c0_25, %c0_26] : memref<16x1xf32, #tpu.memory_space<vmem>>, vector<16x1xf32>
      tpu.vector_store %arg10[%c0_25, %c0_26], %31 {strides = array<i32>} : memref<16x1xf32, #tpu.memory_space<vmem>>, vector<16x1xf32>,
    } else {
    }
    %c0 = arith.constant 0 : index
    %c0_1 = arith.constant 0 : index
    %3 = vector.load %arg2[%c0, %c0_1] : memref<16x128xbf16, #tpu.memory_space<vmem>>, vector<16x128xbf16>
    %c0_2 = arith.constant 0 : index
    %c0_3 = arith.constant 0 : index
    %4 = vector.load %arg3[%c0_2, %c0_3] : memref<128x128xbf16, #tpu.memory_space<vmem>>, vector<128x128xbf16>
    %cst = arith.constant dense<0.000000e+00> : vector<16x128xf32>
    %5 = tpu.matmul %3, %4, %cst {dimension_numbers = #tpu.dot_dimension_numbers<[1], [1], [0], [0], [0, 0, 1, 0], [], []>} : vector<16x128xbf16>, vector<128x128xbf16>, vector<16x128xf32> -> vector<16x128xf32>
    %c0_4 = arith.constant 0 : index
    %c0_5 = arith.constant 0 : index
    %6 = vector.load %arg4[%c0_4, %c0_5] : memref<16x1xi32, #tpu.memory_space<vmem>>, vector<16x1xi32>
    %c0_6 = arith.constant 0 : index
    %c0_7 = arith.constant 0 : index
    %7 = vector.load %arg5[%c0_6, %c0_7] : memref<1x128xi32, #tpu.memory_space<vmem>>, vector<1x128xi32>
    %c16_i32 = arith.constant 16 : i32
    %8 = arith.muli %arg0, %c16_i32 : i32
    %c128_i32 = arith.constant 128 : i32
    %9 = arith.muli %arg1, %c128_i32 : i32
    %c128_i32_8 = arith.constant 128 : i32
    %10 = arith.addi %9, %c128_i32_8 : i32
    %11 = arith.cmpi slt, %8, %10 : i32
    %c16_i32_9 = arith.constant 16 : i32
    %12 = arith.addi %8, %c16_i32_9 : i32
    %13 = arith.cmpi slt, %9, %12 : i32
    %14 = arith.andi %11, %13 : i1
    %c0_i32_10 = arith.constant 0 : i32
    %15 = arith.cmpi eq, %arg1, %c0_i32_10 : i32
    %16 = arith.ori %14, %15 : i1
    %17 = arith.extui %16 : i1 to i32
    %c0_i32_11 = arith.constant 0 : i32
    %18 = arith.cmpi ne, %17, %c0_i32_11 : i32
    scf.if %18 {
      %c0_15 = arith.constant 0 : index
      %c0_16 = arith.constant 0 : index
      %25 = vector.load %arg7[%c0_15, %c0_16] : memref<16x1xf32, #tpu.memory_space<vmem>>, vector<16x1xf32>
      %c0_17 = arith.constant 0 : index
      %c0_18 = arith.constant 0 : index
      %26 = vector.load %arg8[%c0_17, %c0_18] : memref<16x1xf32, #tpu.memory_space<vmem>>, vector<16x1xf32>
      %c0_19 = arith.constant 0 : index
      %c0_20 = arith.constant 0 : index
      %27 = vector.load %arg9[%c0_19, %c0_20] : memref<16x1xf32, #tpu.memory_space<vmem>>, vector<16x1xf32>
      %c0_21 = arith.constant 0 : index
      %c0_22 = arith.constant 0 : index
      %28 = vector.load %arg10[%c0_21, %c0_22] : memref<16x1xf32, #tpu.memory_space<vmem>>, vector<16x1xf32>
      %c128_i32_23 = arith.constant 128 : i32
      %29 = arith.muli %arg1, %c128_i32_23 : i32
      %c0_i32_24 = arith.constant 0 : i32
      %30 = arith.addi %29, %c0_i32_24 : i32
      %31 = tpu.iota {dimensions = array<i32: 1>} : vector<16x128xi32>
      %32 = vector.broadcast %30 : i32 to vector<16x128xi32>
      %33 = arith.addi %32, %31 : vector<16x128xi32>
      %c16_i32_25 = arith.constant 16 : i32
      %34 = arith.muli %arg0, %c16_i32_25 : i32
      %35 = tpu.iota {dimensions = array<i32: 0>} : vector<16x128xi32>
      %36 = vector.broadcast %34 : i32 to vector<16x128xi32>
      %37 = arith.addi %36, %35 : vector<16x128xi32>
      %38 = arith.cmpi ne, %37, %33 : vector<16x128xi32>
      %c16_i32_26 = arith.constant 16 : i32
      %39 = vector.broadcast %c16_i32_26 : i32 to vector<16x128xi32>
      %40 = arith.cmpi slt, %33, %39 : vector<16x128xi32>
      %41 = arith.andi %38, %40 : vector<16x128xi1>
      %cst_27 = arith.constant 0xFF800000 : f32
      %42 = vector.broadcast %cst_27 : f32 to vector<16x128xf32>
      %43 = arith.select %40, %5, %42 : vector<16x128xi1>, vector<16x128xf32>
      %cst_28 = arith.constant dense<0xFF800000> : vector<16xf32>
      %44 = vector.multi_reduction <maximumf>, %43, %cst_28 [1] : vector<16x128xf32> to vector<16xf32>
      %45 = vector.shape_cast %44 : vector<16xf32> to vector<16x1xf32>
      %46 = arith.maximumf %25, %45 : vector<16x1xf32>
      %47 = arith.subf %25, %46 : vector<16x1xf32>
      %48 = math.exp %47 : vector<16x1xf32>
      %49 = vector.broadcast %46 : vector<16x1xf32> to vector<16x128xf32>
      %50 = arith.subf %5, %49 : vector<16x128xf32>
      %51 = math.exp %50 : vector<16x128xf32>
      %cst_29 = arith.constant 0.000000e+00 : f32
      %52 = vector.broadcast %cst_29 : f32 to vector<16x128xf32>
      %53 = arith.select %41, %51, %52 : vector<16x128xi1>, vector<16x128xf32>
      %54 = arith.mulf %48, %26 : vector<16x1xf32>
      %cst_30 = arith.constant dense<0.000000e+00> : vector<16xf32>
      %55 = vector.multi_reduction <add>, %53, %cst_30 [1] : vector<16x128xf32> to vector<16xf32>
      %56 = vector.shape_cast %55 : vector<16xf32> to vector<16x1xf32>
      %57 = arith.addf %54, %56 : vector<16x1xf32>
      %58 = vector.broadcast %6 : vector<16x1xi32> to vector<16x128xi32>
      %59 = vector.broadcast %7 : vector<1x128xi32> to vector<16x128xi32>
      %60 = arith.cmpi eq, %58, %59 : vector<16x128xi32>
      %61 = arith.extui %60 : vector<16x128xi1> to vector<16x128xi32>
      %62 = arith.sitofp %61 : vector<16x128xi32> to vector<16x128xf32>
      %cst_31 = arith.constant 0.000000e+00 : f32
      %63 = vector.broadcast %cst_31 : f32 to vector<16x128xf32>
      %64 = arith.select %41, %62, %63 : vector<16x128xi1>, vector<16x128xf32>
      %65 = arith.mulf %64, %5 : vector<16x128xf32>
      %cst_32 = arith.constant dense<0.000000e+00> : vector<16xf32>
      %66 = vector.multi_reduction <add>, %65, %cst_32 [1] : vector<16x128xf32> to vector<16xf32>
      %67 = vector.shape_cast %66 : vector<16xf32> to vector<16x1xf32>
      %68 = arith.addf %27, %67 : vector<16x1xf32>
      %cst_33 = arith.constant dense<0.000000e+00> : vector<16xf32>
      %69 = vector.multi_reduction <add>, %64, %cst_33 [1] : vector<16x128xf32> to vector<16xf32>
      %70 = vector.shape_cast %69 : vector<16xf32> to vector<16x1xf32>
      %71 = arith.addf %28, %70 : vector<16x1xf32>
      %c0_34 = arith.constant 0 : index
      %c0_35 = arith.constant 0 : index
      %72 = vector.load %arg7[%c0_34, %c0_35] : memref<16x1xf32, #tpu.memory_space<vmem>>, vector<16x1xf32>
      tpu.vector_store %arg7[%c0_34, %c0_35], %46 {strides = array<i32>} : memref<16x1xf32, #tpu.memory_space<vmem>>, vector<16x1xf32>,
      %c0_36 = arith.constant 0 : index
      %c0_37 = arith.constant 0 : index
      %73 = vector.load %arg8[%c0_36, %c0_37] : memref<16x1xf32, #tpu.memory_space<vmem>>, vector<16x1xf32>
      tpu.vector_store %arg8[%c0_36, %c0_37], %57 {strides = array<i32>} : memref<16x1xf32, #tpu.memory_space<vmem>>, vector<16x1xf32>,
      %c0_38 = arith.constant 0 : index
      %c0_39 = arith.constant 0 : index
      %74 = vector.load %arg9[%c0_38, %c0_39] : memref<16x1xf32, #tpu.memory_space<vmem>>, vector<16x1xf32>
      tpu.vector_store %arg9[%c0_38, %c0_39], %68 {strides = array<i32>} : memref<16x1xf32, #tpu.memory_space<vmem>>, vector<16x1xf32>,
      %c0_40 = arith.constant 0 : index
      %c0_41 = arith.constant 0 : index
      %75 = vector.load %arg10[%c0_40, %c0_41] : memref<16x1xf32, #tpu.memory_space<vmem>>, vector<16x1xf32>
      tpu.vector_store %arg10[%c0_40, %c0_41], %71 {strides = array<i32>} : memref<16x1xf32, #tpu.memory_space<vmem>>, vector<16x1xf32>,
    } else {
    }
    %true = arith.constant true
    %19 = arith.xori %16, %true : i1
    %20 = arith.extui %19 : i1 to i32
    %c0_i32_12 = arith.constant 0 : i32
    %21 = arith.cmpi ne, %20, %c0_i32_12 : i32
    scf.if %21 {
      %c0_15 = arith.constant 0 : index
      %c0_16 = arith.constant 0 : index
      %25 = vector.load %arg7[%c0_15, %c0_16] : memref<16x1xf32, #tpu.memory_space<vmem>>, vector<16x1xf32>
      %c0_17 = arith.constant 0 : index
      %c0_18 = arith.constant 0 : index
      %26 = vector.load %arg8[%c0_17, %c0_18] : memref<16x1xf32, #tpu.memory_space<vmem>>, vector<16x1xf32>
      %c0_19 = arith.constant 0 : index
      %c0_20 = arith.constant 0 : index
      %27 = vector.load %arg9[%c0_19, %c0_20] : memref<16x1xf32, #tpu.memory_space<vmem>>, vector<16x1xf32>
      %c0_21 = arith.constant 0 : index
      %c0_22 = arith.constant 0 : index
      %28 = vector.load %arg10[%c0_21, %c0_22] : memref<16x1xf32, #tpu.memory_space<vmem>>, vector<16x1xf32>
      %cst_23 = arith.constant dense<0xFF800000> : vector<16xf32>
      %29 = vector.multi_reduction <maximumf>, %5, %cst_23 [1] : vector<16x128xf32> to vector<16xf32>
      %30 = vector.shape_cast %29 : vector<16xf32> to vector<16x1xf32>
      %31 = arith.maximumf %25, %30 : vector<16x1xf32>
      %32 = arith.subf %25, %31 : vector<16x1xf32>
      %33 = math.exp %32 : vector<16x1xf32>
      %34 = vector.broadcast %31 : vector<16x1xf32> to vector<16x128xf32>
      %35 = arith.subf %5, %34 : vector<16x128xf32>
      %36 = math.exp %35 : vector<16x128xf32>
      %37 = arith.mulf %33, %26 : vector<16x1xf32>
      %cst_24 = arith.constant dense<0.000000e+00> : vector<16xf32>
      %38 = vector.multi_reduction <add>, %36, %cst_24 [1] : vector<16x128xf32> to vector<16xf32>
      %39 = vector.shape_cast %38 : vector<16xf32> to vector<16x1xf32>
      %40 = arith.addf %37, %39 : vector<16x1xf32>
      %41 = vector.broadcast %6 : vector<16x1xi32> to vector<16x128xi32>
      %42 = vector.broadcast %7 : vector<1x128xi32> to vector<16x128xi32>
      %43 = arith.cmpi eq, %41, %42 : vector<16x128xi32>
      %44 = arith.extui %43 : vector<16x128xi1> to vector<16x128xi32>
      %45 = arith.sitofp %44 : vector<16x128xi32> to vector<16x128xf32>
      %46 = arith.mulf %45, %5 : vector<16x128xf32>
      %cst_25 = arith.constant dense<0.000000e+00> : vector<16xf32>
      %47 = vector.multi_reduction <add>, %46, %cst_25 [1] : vector<16x128xf32> to vector<16xf32>
      %48 = vector.shape_cast %47 : vector<16xf32> to vector<16x1xf32>
      %49 = arith.addf %27, %48 : vector<16x1xf32>
      %cst_26 = arith.constant dense<0.000000e+00> : vector<16xf32>
      %50 = vector.multi_reduction <add>, %45, %cst_26 [1] : vector<16x128xf32> to vector<16xf32>
      %51 = vector.shape_cast %50 : vector<16xf32> to vector<16x1xf32>
      %52 = arith.addf %28, %51 : vector<16x1xf32>
      %c0_27 = arith.constant 0 : index
      %c0_28 = arith.constant 0 : index
      %53 = vector.load %arg7[%c0_27, %c0_28] : memref<16x1xf32, #tpu.memory_space<vmem>>, vector<16x1xf32>
      tpu.vector_store %arg7[%c0_27, %c0_28], %31 {strides = array<i32>} : memref<16x1xf32, #tpu.memory_space<vmem>>, vector<16x1xf32>,
      %c0_29 = arith.constant 0 : index
      %c0_30 = arith.constant 0 : index
      %54 = vector.load %arg8[%c0_29, %c0_30] : memref<16x1xf32, #tpu.memory_space<vmem>>, vector<16x1xf32>
      tpu.vector_store %arg8[%c0_29, %c0_30], %40 {strides = array<i32>} : memref<16x1xf32, #tpu.memory_space<vmem>>, vector<16x1xf32>,
      %c0_31 = arith.constant 0 : index
      %c0_32 = arith.constant 0 : index
      %55 = vector.load %arg9[%c0_31, %c0_32] : memref<16x1xf32, #tpu.memory_space<vmem>>, vector<16x1xf32>
      tpu.vector_store %arg9[%c0_31, %c0_32], %49 {strides = array<i32>} : memref<16x1xf32, #tpu.memory_space<vmem>>, vector<16x1xf32>,
      %c0_33 = arith.constant 0 : index
      %c0_34 = arith.constant 0 : index
      %56 = vector.load %arg10[%c0_33, %c0_34] : memref<16x1xf32, #tpu.memory_space<vmem>>, vector<16x1xf32>
      tpu.vector_store %arg10[%c0_33, %c0_34], %52 {strides = array<i32>} : memref<16x1xf32, #tpu.memory_space<vmem>>, vector<16x1xf32>,
    } else {
    }
    %c0_i32_13 = arith.constant 0 : i32
    %22 = arith.cmpi eq, %arg1, %c0_i32_13 : i32
    %23 = arith.extui %22 : i1 to i32
    %c0_i32_14 = arith.constant 0 : i32
    %24 = arith.cmpi ne, %23, %c0_i32_14 : i32
    scf.if %24 {
      %c0_15 = arith.constant 0 : index
      %c0_16 = arith.constant 0 : index
      %25 = vector.load %arg7[%c0_15, %c0_16] : memref<16x1xf32, #tpu.memory_space<vmem>>, vector<16x1xf32>
      %c0_17 = arith.constant 0 : index
      %c0_18 = arith.constant 0 : index
      %26 = vector.load %arg8[%c0_17, %c0_18] : memref<16x1xf32, #tpu.memory_space<vmem>>, vector<16x1xf32>
      %27 = math.log %26 : vector<16x1xf32>
      %28 = arith.addf %25, %27 : vector<16x1xf32>
      %c0_19 = arith.constant 0 : index
      %c0_20 = arith.constant 0 : index
      %29 = vector.load %arg9[%c0_19, %c0_20] : memref<16x1xf32, #tpu.memory_space<vmem>>, vector<16x1xf32>
      %c0_21 = arith.constant 0 : index
      %c0_22 = arith.constant 0 : index
      %30 = vector.load %arg10[%c0_21, %c0_22] : memref<16x1xf32, #tpu.memory_space<vmem>>, vector<16x1xf32>
      %31 = arith.mulf %30, %28 : vector<16x1xf32>
      %32 = arith.subf %29, %31 : vector<16x1xf32>
      %c0_23 = arith.constant 0 : index
      %c0_24 = arith.constant 0 : index
      %33 = vector.load %arg10[%c0_23, %c0_24] : memref<16x1xf32, #tpu.memory_space<vmem>>, vector<16x1xf32>
      %34 = arith.divf %32, %33 : vector<16x1xf32>
      %cst_25 = arith.constant -1.000000e+00 : f32
      %35 = vector.broadcast %cst_25 : f32 to vector<16x1xf32>
      %36 = arith.mulf %35, %34 : vector<16x1xf32>
      %37 = vector.shape_cast %36 : vector<16x1xf32> to vector<16x1xf32>
      %38 = vector.broadcast %37 : vector<16x1xf32> to vector<16x128xf32>
      %c0_26 = arith.constant 0 : index
      %c0_27 = arith.constant 0 : index
      %39 = vector.load %arg6[%c0_26, %c0_27] : memref<16x128xf32, #tpu.memory_space<vmem>>, vector<16x128xf32>
      tpu.vector_store %arg6[%c0_26, %c0_27], %38 {strides = array<i32>} : memref<16x128xf32, #tpu.memory_space<vmem>>, vector<16x128xf32>,
    } else {
    }
    return
  }
  func.func @transform_0(%arg0: i32, %arg1: i32) -> (i32, i32) {
    %c0_i32 = arith.constant 0 : i32
    %c0_i32_0 = arith.constant 0 : i32
    return %arg0, %c0_i32 : i32, i32
  }
  func.func @transform_1(%arg0: i32, %arg1: i32) -> (i32, i32) {
    %c0_i32 = arith.constant 0 : i32
    %c0_i32_0 = arith.constant 0 : i32
    return %arg1, %c0_i32 : i32, i32
  }
  func.func @transform_2(%arg0: i32, %arg1: i32) -> (i32, i32) {
    %c0_i32 = arith.constant 0 : i32
    %c0_i32_0 = arith.constant 0 : i32
    return %arg0, %c0_i32 : i32, i32
  }
  func.func @transform_3(%arg0: i32, %arg1: i32) -> (i32, i32) {
    %c0_i32 = arith.constant 0 : i32
    %c0_i32_0 = arith.constant 0 : i32
    return %c0_i32, %arg1 : i32, i32
  }
  func.func @transform_4(%arg0: i32, %arg1: i32) -> (i32, i32) {
    %c0_i32 = arith.constant 0 : i32
    %c0_i32_0 = arith.constant 0 : i32
    return %arg0, %c0_i32 : i32, i32
  }
}

</mosaic_0001>

<bundles_post_ra>
// kernel: tpu_custom_call.1
= control target key start
LH: loop header
LB: loop body
LE: loop exit
PB: predicated region body
PF: predicated region fallthrough
CT: control target
= control target key end

     0   :  { %9 = vsyncpa [#allocation7], 0  ;;  %s664_s0 = inlined_call_operand.vmem [shape: bf16[16,128], index: 0, kind: input, shape index: {}]   ;;  %s665_s1 = inlined_call_operand.hbm [shape: bf16[128,128], index: 1, kind: input, shape index: {}]   ;;  %s666_s2 = inlined_call_operand.vmem [shape: s32[16,1], index: 2, kind: input, shape index: {}]   ;;  %s667_s3 = inlined_call_operand.vmem [shape: s32[1,128], index: 3, kind: input, shape index: {}]   ;;  %s668_s4 = inlined_call_operand.hbm [shape: f32[16,128], index: 4, kind: output, shape index: {}]  }
   0x1   :  { %10 = vsyncpa [#allocation8], 0  ;;  %s548_s15 = smov [#allocation6]   ;;  %s500_s19 = scalar_lea.hbm %s665_s1, 1024 }
   0x2   :  { %s18_s16 = sshll.u32 %s548_s15, 4  ;;  %p501_p0 = scmp.ne.s32.totalorder %s665_s1, %s500_s19  ;;  %s19_s16 = int_to_ptr.vmem [resolvable:$true] %s18_s16 }
   0x3   :  { %p504_p1 = scmp.lt.u32.totalorder %s500_s19, %s665_s1 }
   0x5   :  { %p506_p2 = pnand %p504_p1, %p501_p0 }
   0x7   :  { %509 = shalt.err (!%p506_p2)
}
   0x8   :  { %s510_s24 = scalar_lea.vmem %s19_s16, 1024  ;;  %p515_p4 = scmp.lt.s32.totalorder %s19_s16, %s19_s16 }
   0x9   :  { %p511_p3 = scmp.ne.s32.totalorder %s19_s16, %s510_s24  ;;  %p516_p5 = scmp.lt.s32.totalorder %s510_s24, %s510_s24 }
   0xb   :  { %p517_p6 = por %p516_p5, %p515_p4 }
   0xd   :  { %p518_p7 = pnand %p517_p6, %p511_p3 }
   0xf   :  { %521 = shalt.err (!%p518_p7)
}
  0x10   :  { %s549_s25 = smov 64   ;;  %s550_s26 = smov 4  }
  0x11   :  { %24 = dma.hbm_to_vmem [thread:$0]  %s665_s1, 1024, %s19_s16, [#allocation7], %s549_s25, %s549_s25, %s550_s26  }
  0x12   :  { %544 = dma.done.wait [#allocation7], 1024  }
  0x13   :  { %545 = vsyncadd [#allocation7], 4294966272  ;;  %v551_v0 = vmov 0.0   ;;  %vm552_vm0 = vmmov 0   ;;  %v475_v1 = vld [vmem:[#allocation6] sm:$0xff]   ;;  %v476_v2 = vld [vmem:[#allocation6 + $0x8] sm:$0xff]   ;;  %v182_v12 = vlaneseq }
  0x14   :  { %443 = vmatprep.subr.bf16.mxu0 %v551_v0  ;;  %459 = vmatprep.mubr.msk.bf16.mxu0 %vm552_vm0, %v551_v0  ;;  %v477_v3 = vld [vmem:[#allocation6 + $0x10] sm:$0xff]   ;;  %v478_v4 = vld [vmem:[#allocation6 + $0x18] sm:$0xff]   ;;  %v479_v5 = vld [vmem:[#allocation6 + $0x20] sm:$0xff]   ;;  %v553_v10 = vmov 0   ;;  %vm37_vm1 = vcmask 7168   ;;  %v554_v11 = vmov -inf  }
  0x15   :  { %444 = vmatpush3.bf16.xpose.msra.mxu0 %v475_v1  ;;  %v480_v6 = vld [vmem:[#allocation6 + $0x28] sm:$0xff]   ;;  %v481_v7 = vld [vmem:[#allocation6 + $0x30] sm:$0xff]   ;;  %v482_v8 = vld [vmem:[#allocation6 + $0x38] sm:$0xff]   ;;  %474 = vset.pattern.permute.xlu0 %v553_v10  ;;  %38 = vst.msk [vmem:[#allocation2] sm:$0xff] %vm37_vm1, %v554_v11  ;;  %v183_v13 = vand.u32 127, %v182_v12  ;;  %v187_v28 = vshrl.u32 %v182_v12, 7 }
  0x16   :  { %445 = vmatprep.subr.bf16.mxu0 %v551_v0  ;;  %v483_v9 = vld [vmem:[%s664_s0] sm:$0xff]   ;;  %473 = vset.pattern.permute.xlu1 %v553_v10  ;;  %39 = vst.msk [vmem:[#allocation2 + $0x8] sm:$0xff] %vm37_vm1, %v554_v11  ;;  %40 = vst.msk [vmem:[#allocation3] sm:$0xff] %vm37_vm1, %v551_v0  ;;  %v160_v30 = vld [vmem:[%s666_s2 + $0x8] sm:$0xff] }
  0x17   :  { %41 = vst.msk [vmem:[#allocation3 + $0x8] sm:$0xff] %vm37_vm1, %v551_v0  ;;  %42 = vst.msk [vmem:[#allocation4] sm:$0xff] %vm37_vm1, %v551_v0  ;;  %vm194_vm2 = vcmp.lt.s32.totalorder %v183_v13, 16  ;;  %v159_v20 = vld [vmem:[%s666_s2] sm:$0xff]  ;;  %vm192_vm3 = vcmp.ne.s32.totalorder %v187_v28, %v183_v13  ;;  %v188_v43 = vadd.s32 8, %v187_v28  ;;  %s555_s2 = smov [#allocation9]  }
  0x18   :  { %43 = vst.msk [vmem:[#allocation4 + $0x8] sm:$0xff] %vm37_vm1, %v551_v0  ;;  %44 = vst.msk [vmem:[#allocation5] sm:$0xff] %vm37_vm1, %v551_v0  ;;  %v433_v31 = vld [vmem:[%s667_s3] ss:$0 sm:$0xff]  ;;  %s408_s3 = sshll.u32 %s555_s2, 4  ;;  %s409_s3 = int_to_ptr.vmem [resolvable:$true] %s408_s3 }
  0x19   :  { %45 = vst.msk [vmem:[#allocation5 + $0x8] sm:$0xff] %vm37_vm1, %v551_v0  ;;  %vm635_vm4 = vmand %vm192_vm3, %vm194_vm2  ;;  %vm193_vm6 = vcmp.ne.s32.totalorder %v188_v43, %v183_v13  ;;  %s522_s9 = scalar_lea.vmem %s409_s3, 256  ;;  %p527_p9 = scmp.lt.s32.totalorder %s409_s3, %s409_s3 }
  0x1a   :  { %vm196_vm8 = vmand %vm193_vm6, %vm194_vm2  ;;  %p523_p8 = scmp.ne.s32.totalorder %s409_s3, %s522_s9  ;;  %p528_p10 = scmp.lt.s32.totalorder %s522_s9, %s522_s9 }
  0x1c   :  { %v174_v21 = vld [vmem:[#allocation2] sm:$0xff]  ;;  %p529_p11 = por %p528_p10, %p527_p9 }
  0x1d   :  { %446 = vmatpush3.bf16.xpose.msra.mxu0 %v476_v2  ;;  %v175_v24 = vld [vmem:[#allocation2 + $0x8] sm:$0xff]  ;;  %v176_v58 = vld [vmem:[#allocation3] sm:$0xff] }
  0x1e   :  { %447 = vmatprep.subr.bf16.mxu0 %v551_v0  ;;  %v177_v62 = vld [vmem:[#allocation3 + $0x8] sm:$0xff]  ;;  %p530_p12 = pnand %p529_p11, %p523_p8 }
  0x1f   :  { %v180_v53 = vld [vmem:[#allocation5] sm:$0xff]  ;;  %v179_v10 = vld [vmem:[#allocation4 + $0x8] sm:$0xff] }
  0x25   :  { %448 = vmatpush3.bf16.xpose.msra.mxu0 %v477_v3  ;;  %v181_v3 = vld [vmem:[#allocation5 + $0x8] sm:$0xff] }
  0x26   :  { %449 = vmatprep.subr.bf16.mxu0 %v551_v0 }
  0x2d   :  { %450 = vmatpush3.bf16.xpose.msra.mxu0 %v478_v4 }
  0x2e   :  { %451 = vmatprep.subr.bf16.mxu0 %v551_v0 }
  0x35   :  { %452 = vmatpush3.bf16.xpose.msra.mxu0 %v479_v5 }
  0x36   :  { %453 = vmatprep.subr.bf16.mxu0 %v551_v0 }
  0x3d   :  { %454 = vmatpush3.bf16.xpose.msra.mxu0 %v480_v6  ;;  %v178_v6 = vld [vmem:[#allocation4] sm:$0xff] }
  0x3e   :  { %455 = vmatprep.subr.bf16.mxu0 %v551_v0 }
  0x45   :  { %456 = vmatpush3.bf16.xpose.msra.mxu0 %v481_v7 }
  0x46   :  { %457 = vmatprep.subr.bf16.mxu0 %v551_v0 }
  0x4d   :  { %458 = vmatpush3.bf16.xpose.msra.mxu0 %v482_v8 }
  0x54   :  { %460 = vmatmul.mubr.bf16.vlgmr.msra.gmra.mrb[0].mxu0 %v483_v9 }
 0x127   :  { %v152_v14 = vpop.f32.mrb[0].mxu0 }
 0x128   :  { %v461_v15 = vpop.f32.mrb[1].mxu0  ;;  %v197_v16 = vsel %vm194_vm2, %v152_v14, -inf }
 0x129   :  { %199 = vmax.xlane.f32.xlu0 %v197_v16  ;;  %v155_v17 = vpop.f32.mrb[2].mxu0 }
 0x12a   :  { %v462_v18 = vpop.f32.mrb[3].mxu0  ;;  %v198_v19 = vsel %vm194_vm2, %v155_v17, -inf }
 0x12d   :  { %201 = vmax.xlane.f32.xlu0 %v198_v19 }
 0x143   :  { %238 = vperm.xlu0 %474, %v159_v20  }
 0x1b6   :  { %v200_v22 = vpop.xlane.xlu0 %199 }
 0x1b7   :  { %v203_v23 = vmax.f32 %v174_v21, %v200_v22 }
 0x1b9   :  { %v205_v25 = vsub.f32 %v174_v21, %v203_v23  ;;  %270 = vst.msk [vmem:[#allocation2] sm:$0xff] %vm37_vm1, %v203_v23  ;;  %213 = vperm.xlu1 %473, %v203_v23  }
 0x1ba   :  { %v202_v26 = vpop.xlane.xlu0 %201 }
 0x1bb   :  { %v204_v27 = vmax.f32 %v175_v24, %v202_v26  ;;  %v207_v55 = vmul.f32 1.442695, %v205_v25 }
 0x1bd   :  { %v206_v29 = vsub.f32 %v175_v24, %v204_v27  ;;  %271 = vst.msk [vmem:[#allocation2 + $0x8] sm:$0xff] %vm37_vm1, %v204_v27  ;;  %218 = vperm.xlu1 %473, %v204_v27  }
 0x1bf   :  { %v209_v56 = vmul.f32 1.442695, %v206_v29 }
 0x1c0   :  { %v367_v18 = vld [vmem:[#allocation2] sm:$0xff] }
 0x1c1   :  { %241 = vperm.xlu1 %473, %v160_v30  }
 0x1c2   :  { %v239_v32 = vpop.permute.xlu0 %238 }
 0x1c3   :  { %vm247_vm5 = vcmp.eq.s32.totalorder %v239_v32, %v433_v31 }
 0x1c4   :  { %v429_v34 = vsel %vm247_vm5, 1.0, %v551_v0  ;;  %v368_v25 = vld [vmem:[#allocation2 + $0x8] sm:$0xff] }
 0x1c5   :  { %v253_v35 = vsel %vm635_vm4, %v429_v34, 0.0 }
 0x1c6   :  { %263 = vadd.xlane.f32.xlu0 %v253_v35  ;;  %v255_v36 = vmul.f32 %v253_v35, %v152_v14 }
 0x238   :  { %v214_v37 = vpop.permute.xlu1 %213 }
 0x239   :  { %v221_v38 = vsub.f32 %v152_v14, %v214_v37 }
 0x23b   :  { %v223_v39 = vmul.f32 1.442695, %v221_v38 }
 0x23c   :  { %v219_v40 = vpop.permute.xlu1 %218 }
 0x23d   :  { %484 = vpow2.f32 %v223_v39  ;;  %v222_v41 = vsub.f32 %v155_v17, %v219_v40 }
 0x23f   :  { %v225_v42 = vmul.f32 1.442695, %v222_v41 }
 0x240   :  { %v242_v45 = vpop.permute.xlu1 %241 }
 0x241   :  { %486 = vpow2.f32 %v225_v42  ;;  %vm248_vm7 = vcmp.eq.s32.totalorder %v242_v45, %v433_v31 }
 0x242   :  { %v430_v49 = vsel %vm248_vm7, 1.0, %v551_v0  ;;  %488 = vpow2.f32 %v207_v55 }
 0x243   :  { %v254_v50 = vsel %vm196_vm8, %v430_v49, 0.0  ;;  %490 = vpow2.f32 %v209_v56 }
 0x244   :  { %v256_v51 = vmul.f32 %v254_v50, %v155_v17 }
 0x247   :  { %v485_v44 = vpop.eup %484 }
 0x248   :  { %v227_v46 = vsel %vm635_vm4, %v485_v44, 0.0 }
 0x249   :  { %231 = vadd.xlane.f32.xlu1 %v227_v46 }
 0x24b   :  { %v487_v47 = vpop.eup %486 }
 0x24c   :  { %v228_v48 = vsel %vm196_vm8, %v487_v47, 0.0  ;;  %v489_v57 = vpop.eup %488 }
 0x24d   :  { %233 = vadd.xlane.f32.xlu1 %v228_v48  ;;  %v229_v59 = vmul.f32 %v489_v57, %v176_v58  ;;  %v491_v60 = vpop.eup %490 }
 0x24e   :  { %v230_v0 = vmul.f32 %v491_v60, %v177_v62 }
 0x251   :  { %265 = vadd.xlane.f32.xlu1 %v254_v50 }
 0x253   :  { %v264_v52 = vpop.xlane.xlu0 %263 }
 0x254   :  { %v267_v54 = vadd.f32 %v264_v52, %v180_v53 }
 0x255   :  { %257 = vadd.xlane.f32.xlu1 %v255_v36 }
 0x256   :  { %276 = vst.msk [vmem:[#allocation5] sm:$0xff] %vm37_vm1, %v267_v54 }
 0x259   :  { %259 = vadd.xlane.f32.xlu1 %v256_v51 }
 0x25d   :  { %v379_v11 = vld [vmem:[#allocation5] sm:$0xff] }
 0x2d6   :  { %v232_v61 = vpop.xlane.xlu1 %231 }
 0x2d7   :  { %v235_v63 = vadd.f32 %v232_v61, %v229_v59 }
 0x2d9   :  { %272 = vst.msk [vmem:[#allocation3] sm:$0xff] %vm37_vm1, %v235_v63 }
 0x2da   :  { %v234_v1 = vpop.xlane.xlu1 %233 }
 0x2db   :  { %v236_v2 = vadd.f32 %v234_v1, %v230_v0 }
 0x2dd   :  { %273 = vst.msk [vmem:[#allocation3 + $0x8] sm:$0xff] %vm37_vm1, %v236_v2 }
 0x2de   :  { %v266_v4 = vpop.xlane.xlu1 %265 }
 0x2df   :  { %v268_v5 = vadd.f32 %v266_v4, %v181_v3 }
 0x2e0   :  { %v369_v7 = vld [vmem:[#allocation3] sm:$0xff] }
 0x2e1   :  { %277 = vst.msk [vmem:[#allocation5 + $0x8] sm:$0xff] %vm37_vm1, %v268_v5  ;;  %492 = vlog2.f32 %v369_v7 }
 0x2e2   :  { %v258_v8 = vpop.xlane.xlu1 %257 }
 0x2e3   :  { %v261_v9 = vadd.f32 %v258_v8, %v178_v6 }
 0x2e4   :  { %v370_v12 = vld [vmem:[#allocation3 + $0x8] sm:$0xff] }
 0x2e5   :  { %274 = vst.msk [vmem:[#allocation4] sm:$0xff] %vm37_vm1, %v261_v9  ;;  %494 = vlog2.f32 %v370_v12 }
 0x2e6   :  { %v260_v13 = vpop.xlane.xlu1 %259  ;;  %496 = vrcp.f32 %v379_v11 }
 0x2e7   :  { %v262_v14 = vadd.f32 %v260_v13, %v179_v10 }
 0x2e8   :  { %v380_v15 = vld [vmem:[#allocation5 + $0x8] sm:$0xff] }
 0x2e9   :  { %275 = vst.msk [vmem:[#allocation4 + $0x8] sm:$0xff] %vm37_vm1, %v262_v14  ;;  %498 = vrcp.f32 %v380_v15 }
 0x2eb   :  { %v493_v16 = vpop.eup %492 }
 0x2ec   :  { %v372_v17 = vmul.f32 0.6931472, %v493_v16  ;;  %v377_v24 = vld [vmem:[#allocation4] sm:$0xff] }
 0x2ee   :  { %v375_v19 = vadd.f32 %v372_v17, %v367_v18 }
 0x2ef   :  { %v495_v20 = vpop.eup %494 }
 0x2f0   :  { %v381_v21 = vmul.f32 %v379_v11, %v375_v19  ;;  %v374_v22 = vmul.f32 0.6931472, %v495_v20  ;;  %v497_v23 = vpop.eup %496  ;;  %v378_v30 = vld [vmem:[#allocation4 + $0x8] sm:$0xff] }
 0x2f2   :  { %v383_v26 = vsub.f32 %v377_v24, %v381_v21  ;;  %v376_v27 = vadd.f32 %v374_v22, %v368_v25 }
 0x2f3   :  { %v499_v33 = vpop.eup %498 }
 0x2f4   :  { %v386_v28 = vmul.f32 %v497_v23, %v383_v26  ;;  %v382_v29 = vmul.f32 %v380_v15, %v376_v27 }
 0x2f6   :  { %v389_v31 = vmul.f32 -1.0, %v386_v28  ;;  %v384_v32 = vsub.f32 %v378_v30, %v382_v29 }
 0x2f8   :  { %393 = vperm.xlu1 %473, %v389_v31   ;;  %v388_v34 = vmul.f32 %v499_v33, %v384_v32 }
 0x2fa   :  { %v390_v35 = vmul.f32 -1.0, %v388_v34 }
 0x2fc   :  { %398 = vperm.xlu1 %473, %v390_v35  }
 0x377   :  { %v394_v36 = vpop.permute.xlu1 %393 }
 0x378   :  { %401 = vst [vmem:[#allocation9] sm:$0xff] %v394_v36 }
 0x37b   :  { %v399_v37 = vpop.permute.xlu1 %398 }
 0x37c   :  { %402 = vst [vmem:[#allocation9 + $0x8] sm:$0xff] %v399_v37 }
 0x37d   :  { %533 = shalt.err (!%p530_p12)
}
 0x37e   :  { %s534_s12 = scalar_lea.hbm %s668_s4, 256 }
 0x37f   :  { %p535_p13 = scmp.ne.s32.totalorder %s668_s4, %s534_s12  ;;  %p538_p0 = scmp.lt.u32.totalorder %s534_s12, %s668_s4 }
 0x381   :  { %p540_p1 = pnand %p538_p0, %p535_p13 }
 0x383   :  { %543 = shalt.err (!%p540_p1)
}
 0x384   :  { %s556_s17 = smov 128   ;;  %s557_s18 = smov 8  }
 0x385   :  { %414 = dma.vmem_to_hbm [thread:$0]  %s409_s3, 256, %s668_s4, [#allocation8], %s556_s17, %s556_s17, %s557_s18  }
 0x386   :  { %546 = dma.done.wait [#allocation8], 256  }
 0x387   :  { %547 = vsyncadd [#allocation8], 4294967040 }
 0x388   :  { %418 = vsyncpa [#allocation7], 1 }
 0x389   :  { %419 = vsyncpa [#allocation8], 1 }

</bundles_post_ra>
